<compile_context>
chip_gen: v5e
topology: v5e:2x2
jax: 0.10.0
libtpu: 0.0.40
codegen_flags: <defaults>
</compile_context>

<pallas_src>
import functools

import jax
import jax.numpy as jnp
from jax.experimental import pallas as pl
from jax.experimental.pallas import tpu as pltpu


def textcnn_kernel(x_ref, wc_ref, wfc_ref, b_ref, out_ref, *,
                   tb, seq_len, out_channels, kernel_heights):
    TB, S, C = tb, seq_len, out_channels
    D = x_ref.shape[-1]
    N = TB * S
    kh_max = max(kernel_heights)
    Cp = wc_ref.shape[-1]          # padded fused conv width (>= 3*C)
    Ep = wfc_ref.shape[-1]         # padded embedding width

    # Flatten batch*time into the matmul M dimension (f32 load, no extra cast).
    x2 = x_ref[...].reshape(N, D)
    # Append kh_max-1 zero rows so every tap takes a full-length (N, D) slice.
    ext = jnp.concatenate([x2, jnp.zeros((kh_max - 1, D), x2.dtype)], axis=0)

    # Fused unfold for ALL convs: u[r, j*D:(j+1)*D] = x2[r + j].
    # Row shifts are done on f32 data (robust sublane slicing); the wide
    # materialized unfold itself is bf16 (half the store/load bytes).
    u = jnp.concatenate(
        [ext[j:j + N, :].astype(jnp.bfloat16) for j in range(kh_max)], axis=-1)

    # Single MXU matmul for all three convs (weights stacked column-wise,
    # unused taps of the shorter convs are zero rows).
    acc = jnp.dot(u, wc_ref[...], preferred_element_type=jnp.float32)  # (N, Cp)
    acc = acc.reshape(TB, S, Cp)

    # Per-lane valid-length mask: lanes [i*C, (i+1)*C) belong to conv i with
    # valid output length L_i = S - kh_i + 1.  Positions t >= L_i read rows of
    # the next batch element, so mask them out of the time max-pool.
    t = jax.lax.broadcasted_iota(jnp.int32, (S, Cp), 0)
    c = jax.lax.broadcasted_iota(jnp.int32, (S, Cp), 1)
    Lvec = jnp.full((S, Cp), S, jnp.int32)
    for i, kh in enumerate(kernel_heights):
        Lvec = jnp.where((c >= i * C) & (c < (i + 1) * C), S - kh + 1, Lvec)
    acc = jnp.where((t < Lvec)[None], acc, -jnp.inf)

    m = jnp.max(acc, axis=1)                                   # (TB, Cp) pool
    # Bias + ReLU after the pool (bias time-invariant, ReLU monotone).
    feats = jnp.maximum(m + b_ref[0:1, :Cp], 0.0)              # (TB, Cp)

    embd = jnp.dot(feats.astype(wfc_ref.dtype), wfc_ref[...],
                   preferred_element_type=jnp.float32)         # (TB, Ep)
    out_ref[...] = jnp.maximum(embd + b_ref[1:2, :Ep], 0.0).astype(out_ref.dtype)


def textcnn_forward(x, params, kernel_heights, *, tb=8, lane=128):
    """x: (B, S, D) float32.  params: logical (unpadded) weights, see init_params."""
    B, S, D = x.shape
    C = params["w1"].shape[-1]
    E = params["wfc"].shape[-1]
    khs = tuple(kernel_heights)
    kh_max = max(khs)
    assert B % tb == 0, "batch must be a multiple of the batch tile"
    assert S >= kh_max, "seq_len must be >= max kernel height (PyTorch conv would fail)"

    rup = lambda n: ((n + lane - 1) // lane) * lane
    Cp = rup(len(khs) * C)          # fused conv output lanes (3C padded)
    Ep = rup(E)
    P = max(Cp, Ep)

    # ---- pack / pad weights: one fused conv weight, one fc weight, one bias --
    wc = jnp.zeros((kh_max * D, Cp), jnp.float32)
    b_conv = []
    for i, kh in enumerate(khs):
        w = params[f"w{i + 1}"]                         # (kh, D, C)
        wc = wc.at[:kh * D, i * C:(i + 1) * C].set(w.reshape(kh * D, C))
        b_conv.append(params[f"b{i + 1}"])
    wc = wc.astype(jnp.bfloat16)

    wfc_p = (jnp.zeros((Cp, Ep), jnp.float32)
             .at[:len(khs) * C, :E].set(params["wfc"])
             .astype(jnp.bfloat16))

    b_all = jnp.zeros((2, P), jnp.float32)
    b_all = b_all.at[0, :len(khs) * C].set(jnp.concatenate(b_conv))
    b_all = b_all.at[1, :E].set(params["bfc"])

    kernel = functools.partial(textcnn_kernel, tb=tb, seq_len=S,
                               out_channels=C, kernel_heights=khs)

    out = pl.pallas_call(
        kernel,
        out_shape=jax.ShapeDtypeStruct((B, Ep), jnp.float32),
        grid_spec=pltpu.PrefetchScalarGridSpec(
            num_scalar_prefetch=0,
            grid=(B // tb,),
            in_specs=[
                pl.BlockSpec((tb, S, D), lambda b: (b, 0, 0)),      # x batch tile
                pl.BlockSpec((kh_max * D, Cp), lambda b: (0, 0)),   # fused conv weight
                pl.BlockSpec((Cp, Ep), lambda b: (0, 0)),           # fc weight
                pl.BlockSpec((2, P), lambda b: (0, 0)),             # packed biases
            ],
            out_specs=pl.BlockSpec((tb, Ep), lambda b: (b, 0)),     # lane-dense store
        ),
        compiler_params=pltpu.CompilerParams(
            dimension_semantics=("parallel",)),        # shard batch tiles over TCs
    )(x, wc, wfc_p, b_all)
    return out[:, :E]


def init_params(key, input_dim, embd_size, out_channels, kernel_heights):
    """Deterministic synthetic weights matching the nn.Module shapes.

    PyTorch conv weight is (C, 1, kh, D); stored here transposed per-tap as
    (kh, D, C).  The Linear weight (E, 3C) is stored pre-transposed as (3C, E).
    """
    keys = jax.random.split(key, 8)
    C, E, D = out_channels, embd_size, input_dim
    p = {}
    for i, kh in enumerate(kernel_heights):
        p[f"w{i + 1}"] = 0.1 * jax.random.normal(keys[2 * i], (kh, D, C), jnp.float32)
        p[f"b{i + 1}"] = 0.1 * jax.random.normal(keys[2 * i + 1], (C,), jnp.float32)
    p["wfc"] = 0.1 * jax.random.normal(keys[6], (3 * C, E), jnp.float32)
    p["bfc"] = 0.1 * jax.random.normal(keys[7], (E,), jnp.float32)
    return p


def textcnn_reference(x, params, kernel_heights):
    """Plain-JAX reference using the module's original op order
    (conv+bias -> ReLU -> max-pool -> concat -> Linear -> ReLU), with the
    kernel's bf16 input/weight rounding emulated."""
    f32, bf16 = jnp.float32, jnp.bfloat16
    rb = lambda a: a.astype(bf16).astype(f32)
    hi = jax.lax.Precision.HIGHEST
    B, S, D = x.shape
    xb = rb(x)
    feats = []
    for i, kh in enumerate(kernel_heights):
        w, b = rb(params[f"w{i + 1}"]), params[f"b{i + 1}"]
        L = S - kh + 1
        acc = sum(jnp.einsum("bld,dc->blc", xb[:, j:j + L, :], w[j], precision=hi)
                  for j in range(kh))
        act = jax.nn.relu(acc + b[None, None, :])
        feats.append(jnp.max(act, axis=1))
    f = jnp.concatenate(feats, axis=1)
    emb = jnp.matmul(rb(f), rb(params["wfc"]), precision=hi) + params["bfc"]
    return jax.nn.relu(emb)


if __name__ == "__main__":
    # Small shapes consistent with the module's forward:
    #   frame_x: (batch, seq_len, feat_dim) with feat_dim == input_dim
    B, S, D = 16, 16, 16           # batch tiled by tb=8 -> grid of 2 parallel steps
    C, E = 32, 32                  # out_channels, embd_size (defaults shrunk)
    kernel_heights = (3, 4, 5)

    key = jax.random.PRNGKey(0)
    kx, kp = jax.random.split(key)
    x = jax.random.normal(kx, (B, S, D), jnp.float32)
    params = init_params(kp, D, E, C, kernel_heights)

    out = textcnn_forward(x, params, kernel_heights, tb=8)
    out = jax.block_until_ready(out)

    ref = textcnn_reference(x, params, kernel_heights)
    assert out.shape == (B, E)
    assert jnp.allclose(out, ref, atol=2e-2, rtol=2e-2), \
        float(jnp.max(jnp.abs(out - ref)))

    print("KERNEL_OK")
</pallas_src>

<mosaic_0001>
module attributes {stable_mosaic.version = 11 : i64} {
  func.func @textcnn_kernel(%arg0: i32, %arg1: memref<8x16x16xf32, #tpu.memory_space<vmem>>, %arg2: memref<80x128xbf16, #tpu.memory_space<vmem>>, %arg3: memref<128x128xbf16, #tpu.memory_space<vmem>>, %arg4: memref<2x128xf32, #tpu.memory_space<vmem>>, %arg5: memref<8x128xf32, #tpu.memory_space<vmem>>) attributes {dimension_semantics = [#tpu.dimension_semantics<parallel>], iteration_bounds = array<i64: 2>, scalar_prefetch = 0 : i64, scratch_operands = 0 : i64, tpu.core_type = #tpu.core_type<tc>, window_params = [{transform_indices = @transform_0, window_bounds = array<i64: 8, 16, 16>}, {pipeline_mode = #tpu.pipeline_mode<synchronous>, transform_indices = @transform_1, window_bounds = array<i64: 80, 128>}, {pipeline_mode = #tpu.pipeline_mode<synchronous>, transform_indices = @transform_2, window_bounds = array<i64: 128, 128>}, {pipeline_mode = #tpu.pipeline_mode<synchronous>, transform_indices = @transform_3, window_bounds = array<i64: 2, 128>}, {transform_indices = @transform_4, window_bounds = array<i64: 8, 128>}]} {
    %c0 = arith.constant 0 : index
    %c0_0 = arith.constant 0 : index
    %c0_1 = arith.constant 0 : index
    %0 = vector.load %arg1[%c0, %c0_0, %c0_1] : memref<8x16x16xf32, #tpu.memory_space<vmem>>, vector<8x16x16xf32>
    %1 = vector.shape_cast %0 : vector<8x16x16xf32> to vector<128x16xf32>
    %cst = arith.constant 0.000000e+00 : f32
    %2 = vector.broadcast %cst : f32 to vector<4x16xf32>
    %3 = tpu.concatenate %1, %2 in 0 : vector<128x16xf32>, vector<4x16xf32> -> vector<132x16xf32>
    %4 = vector.extract_strided_slice %3 {offsets = [0, 0], sizes = [128, 16], strides = [1, 1]} : vector<132x16xf32> to vector<128x16xf32>
    %5 = arith.truncf %4 : vector<128x16xf32> to vector<128x16xbf16>
    %6 = vector.extract_strided_slice %3 {offsets = [1, 0], sizes = [128, 16], strides = [1, 1]} : vector<132x16xf32> to vector<128x16xf32>
    %7 = arith.truncf %6 : vector<128x16xf32> to vector<128x16xbf16>
    %8 = vector.extract_strided_slice %3 {offsets = [2, 0], sizes = [128, 16], strides = [1, 1]} : vector<132x16xf32> to vector<128x16xf32>
    %9 = arith.truncf %8 : vector<128x16xf32> to vector<128x16xbf16>
    %10 = vector.extract_strided_slice %3 {offsets = [3, 0], sizes = [128, 16], strides = [1, 1]} : vector<132x16xf32> to vector<128x16xf32>
    %11 = arith.truncf %10 : vector<128x16xf32> to vector<128x16xbf16>
    %12 = vector.extract_strided_slice %3 {offsets = [4, 0], sizes = [128, 16], strides = [1, 1]} : vector<132x16xf32> to vector<128x16xf32>
    %13 = arith.truncf %12 : vector<128x16xf32> to vector<128x16xbf16>
    %14 = tpu.concatenate %5, %7, %9, %11, %13 in 1 : vector<128x16xbf16>, vector<128x16xbf16>, vector<128x16xbf16>, vector<128x16xbf16>, vector<128x16xbf16> -> vector<128x80xbf16>
    %c0_2 = arith.constant 0 : index
    %c0_3 = arith.constant 0 : index
    %15 = vector.load %arg2[%c0_2, %c0_3] : memref<80x128xbf16, #tpu.memory_space<vmem>>, vector<80x128xbf16>
    %cst_4 = arith.constant dense<0.000000e+00> : vector<128x128xf32>
    %16 = tpu.matmul %14, %15, %cst_4 {dimension_numbers = #tpu.dot_dimension_numbers<[1], [0], [0], [1], [0, 0, 1, 1], [], []>} : vector<128x80xbf16>, vector<80x128xbf16>, vector<128x128xf32> -> vector<128x128xf32>
    %17 = vector.shape_cast %16 : vector<128x128xf32> to vector<8x16x128xf32>
    %18 = tpu.iota {dimensions = array<i32: 0>} : vector<16x128xi32>
    %19 = tpu.iota {dimensions = array<i32: 1>} : vector<16x128xi32>
    %c16_i32 = arith.constant 16 : i32
    %20 = vector.broadcast %c16_i32 : i32 to vector<16x128xi32>
    %c0_i32 = arith.constant 0 : i32
    %21 = vector.broadcast %c0_i32 : i32 to vector<16x128xi32>
    %22 = arith.cmpi sge, %19, %21 : vector<16x128xi32>
    %c32_i32 = arith.constant 32 : i32
    %23 = vector.broadcast %c32_i32 : i32 to vector<16x128xi32>
    %24 = arith.cmpi slt, %19, %23 : vector<16x128xi32>
    %25 = arith.andi %22, %24 : vector<16x128xi1>
    %c14_i32 = arith.constant 14 : i32
    %26 = vector.broadcast %c14_i32 : i32 to vector<16x128xi32>
    %27 = arith.select %25, %26, %20 : vector<16x128xi1>, vector<16x128xi32>
    %c32_i32_5 = arith.constant 32 : i32
    %28 = vector.broadcast %c32_i32_5 : i32 to vector<16x128xi32>
    %29 = arith.cmpi sge, %19, %28 : vector<16x128xi32>
    %c64_i32 = arith.constant 64 : i32
    %30 = vector.broadcast %c64_i32 : i32 to vector<16x128xi32>
    %31 = arith.cmpi slt, %19, %30 : vector<16x128xi32>
    %32 = arith.andi %29, %31 : vector<16x128xi1>
    %c13_i32 = arith.constant 13 : i32
    %33 = vector.broadcast %c13_i32 : i32 to vector<16x128xi32>
    %34 = arith.select %32, %33, %27 : vector<16x128xi1>, vector<16x128xi32>
    %c64_i32_6 = arith.constant 64 : i32
    %35 = vector.broadcast %c64_i32_6 : i32 to vector<16x128xi32>
    %36 = arith.cmpi sge, %19, %35 : vector<16x128xi32>
    %c96_i32 = arith.constant 96 : i32
    %37 = vector.broadcast %c96_i32 : i32 to vector<16x128xi32>
    %38 = arith.cmpi slt, %19, %37 : vector<16x128xi32>
    %39 = arith.andi %36, %38 : vector<16x128xi1>
    %c12_i32 = arith.constant 12 : i32
    %40 = vector.broadcast %c12_i32 : i32 to vector<16x128xi32>
    %41 = arith.select %39, %40, %34 : vector<16x128xi1>, vector<16x128xi32>
    %42 = arith.cmpi slt, %18, %41 : vector<16x128xi32>
    %43 = vector.shape_cast %42 : vector<16x128xi1> to vector<1x16x128xi1>
    %cst_7 = arith.constant 0xFF800000 : f32
    %44 = vector.shape_cast %43 : vector<1x16x128xi1> to vector<1x16x128xi1>
    %45 = vector.broadcast %44 : vector<1x16x128xi1> to vector<8x16x128xi1>
    %46 = vector.broadcast %cst_7 : f32 to vector<8x16x128xf32>
    %47 = arith.select %45, %17, %46 : vector<8x16x128xi1>, vector<8x16x128xf32>
    %cst_8 = arith.constant dense<0xFF800000> : vector<8x128xf32>
    %48 = vector.multi_reduction <maximumf>, %47, %cst_8 [1] : vector<8x16x128xf32> to vector<8x128xf32>
    %c0_9 = arith.constant 0 : index
    %c0_10 = arith.constant 0 : index
    %49 = vector.load %arg4[%c0_9, %c0_10] : memref<2x128xf32, #tpu.memory_space<vmem>>, vector<1x128xf32>
    %50 = vector.broadcast %49 : vector<1x128xf32> to vector<8x128xf32>
    %51 = arith.addf %48, %50 : vector<8x128xf32>
    %cst_11 = arith.constant 0.000000e+00 : f32
    %52 = vector.broadcast %cst_11 : f32 to vector<8x128xf32>
    %53 = arith.maximumf %51, %52 : vector<8x128xf32>
    %54 = arith.truncf %53 : vector<8x128xf32> to vector<8x128xbf16>
    %c0_12 = arith.constant 0 : index
    %c0_13 = arith.constant 0 : index
    %55 = vector.load %arg3[%c0_12, %c0_13] : memref<128x128xbf16, #tpu.memory_space<vmem>>, vector<128x128xbf16>
    %cst_14 = arith.constant dense<0.000000e+00> : vector<8x128xf32>
    %56 = tpu.matmul %54, %55, %cst_14 {dimension_numbers = #tpu.dot_dimension_numbers<[1], [0], [0], [1], [0, 0, 1, 1], [], []>} : vector<8x128xbf16>, vector<128x128xbf16>, vector<8x128xf32> -> vector<8x128xf32>
    %c1 = arith.constant 1 : index
    %c0_15 = arith.constant 0 : index
    %57 = vector.load %arg4[%c1, %c0_15] : memref<2x128xf32, #tpu.memory_space<vmem>>, vector<1x128xf32>
    %58 = vector.broadcast %57 : vector<1x128xf32> to vector<8x128xf32>
    %59 = arith.addf %56, %58 : vector<8x128xf32>
    %cst_16 = arith.constant 0.000000e+00 : f32
    %60 = vector.broadcast %cst_16 : f32 to vector<8x128xf32>
    %61 = arith.maximumf %59, %60 : vector<8x128xf32>
    %c0_17 = arith.constant 0 : index
    %c0_18 = arith.constant 0 : index
    %62 = vector.load %arg5[%c0_17, %c0_18] : memref<8x128xf32, #tpu.memory_space<vmem>>, vector<8x128xf32>
    tpu.vector_store %arg5[%c0_17, %c0_18], %61 {strides = array<i32>} : memref<8x128xf32, #tpu.memory_space<vmem>>, vector<8x128xf32>,
    return
  }
  func.func @transform_0(%arg0: i32) -> (i32, i32, i32) {
    %c0_i32 = arith.constant 0 : i32
    %c0_i32_0 = arith.constant 0 : i32
    %c0_i32_1 = arith.constant 0 : i32
    return %arg0, %c0_i32, %c0_i32_0 : i32, i32, i32
  }
  func.func @transform_1(%arg0: i32) -> (i32, i32) {
    %c0_i32 = arith.constant 0 : i32
    %c0_i32_0 = arith.constant 0 : i32
    %c0_i32_1 = arith.constant 0 : i32
    return %c0_i32, %c0_i32_0 : i32, i32
  }
  func.func @transform_2(%arg0: i32) -> (i32, i32) {
    %c0_i32 = arith.constant 0 : i32
    %c0_i32_0 = arith.constant 0 : i32
    %c0_i32_1 = arith.constant 0 : i32
    return %c0_i32, %c0_i32_0 : i32, i32
  }
  func.func @transform_3(%arg0: i32) -> (i32, i32) {
    %c0_i32 = arith.constant 0 : i32
    %c0_i32_0 = arith.constant 0 : i32
    %c0_i32_1 = arith.constant 0 : i32
    return %c0_i32, %c0_i32_0 : i32, i32
  }
  func.func @transform_4(%arg0: i32) -> (i32, i32) {
    %c0_i32 = arith.constant 0 : i32
    %c0_i32_0 = arith.constant 0 : i32
    return %arg0, %c0_i32 : i32, i32
  }
}

</mosaic_0001>

<bundles_post_ra>
// kernel: tpu_custom_call.1
= control target key start
LH: loop header
LB: loop body
LE: loop exit
PB: predicated region body
PF: predicated region fallthrough
CT: control target
= control target key end

     0   :  { %9 = vsyncpa [#allocation3], 0  ;;  %s1868_s0 = inlined_call_operand.hbm [shape: f32[16,16,16], index: 0, kind: input, shape index: {}]   ;;  %s1869_s1 = inlined_call_operand.hbm [shape: bf16[80,128], index: 1, kind: input, shape index: {}]   ;;  %s1870_s2 = inlined_call_operand.hbm [shape: bf16[128,128], index: 2, kind: input, shape index: {}]   ;;  %s1871_s3 = inlined_call_operand.vmem [shape: f32[2,128], index: 3, kind: input, shape index: {}]   ;;  %s1872_s4 = inlined_call_operand.hbm [shape: f32[16,128], index: 4, kind: output, shape index: {}]  }
   0x1   :  { %11 = vsyncpa [#allocation3 + $0x1], 0 }
   0x2   :  { %12 = vsyncpa [#allocation6], 0 }
   0x3   :  { %13 = vsyncpa [#allocation4], 0 }
   0x4   :  { %15 = vsyncpa [#allocation4 + $0x1], 0  ;;  %s1438_s15 = smov 0   ;;  %s1440_s16 = smov 0  }
   0x5   :  { %s1442_s17 = smov 0   ;;  %s1444_s18 = smov 0  }
   0x6 LB: > { %s1459_s19 = sadd.s32 4294967295, %s1399_s18   ;;  %s1057_s20 = sadd.s32 4294967294, %s1399_s18   ;;  %s1399_s18 = sphi %s1444_s18, %s1886_s18   ;;  %s1395_s17 = sphi %s1442_s17, %s1885_s17   ;;  %s1391_s16 = sphi %s1440_s16, %s1884_s16   ;;  %s1387_s15 = sphi %s1438_s15, %s1883_s15  }
   0x7   : > { %p41_p0 = scmp.ne.s32.totalorder %s1391_s16, %s1387_s15  ;;  %p42_p1 = scmp.eq.s32.totalorder %s1459_s19, 0 }
   0x8   : > { %p128_p2 = scmp.eq.s32.totalorder %s1459_s19, 1  ;;  %p134_p3 = scmp.eq.s32.totalorder %s1057_s20, 1 }
   0x9   : > { %p1468_p4 = por %p42_p1, %p41_p0  ;;  %p1058_p5 = scmp.ge.s32.totalorder %s1399_s18, 1 }
   0xa   : > { %p1473_p6 = por %p134_p3, %p41_p0  ;;  %p141_p7 = scmp.lt.s32.totalorder %s1399_s18, 3 }
   0xb   : > { %s152_s25 = sshll.u32 %s1869_s1, 4  ;;  %s1401_s27 = smov [#allocation5]   ;;  %s153_s25 = int_to_ptr.hbm [resolvable:$true] %s152_s25 }
   0xc   : > { %p1481_p8 = pnand %p1058_p5, %p141_p7  ;;  %s154_s28 = sshll.u32 %s1401_s27, 4  ;;  %s155_s28 = int_to_ptr.vmem [resolvable:$true] %s154_s28 }
   0xd   : > { %s166_s5 = sshll.u32 %s1870_s2, 4  ;;  %s1402_s6 = smov 64   ;;  %s167_s5 = int_to_ptr.hbm [resolvable:$true] %s166_s5 }
   0xe   : > { %p1172_p9 = pneg %p1481_p8  ;;  %s1403_s7 = smov 4  }
   0xf   : > { %s1404_s8 = smov [#allocation7]   ;;  %s1494_s10 = sadd.s32 1, %s1399_s18  }
  0x10   : > { %p1173_p10 = pnand %p1172_p9, %p42_p1  ;;  %s168_s9 = sshll.u32 %s1404_s8, 4  ;;  %s169_s9 = int_to_ptr.vmem [resolvable:$true] %s168_s9 }
  0x11   : > { %s28_s11 = sadd.s32 1, %s1395_s17  ;;  %s25_s12 = ssub.s32 %s1399_s18, %s1494_s10 }
  0x12   : > { %1175 = dma.hbm_to_vmem [thread:$0]  (!%p1173_p10), %s153_s25, 640, %s155_s28, [#allocation6], %s1402_s6, %s1402_s6, %s1403_s7  }
  0x13   : > { %1178 = dma.hbm_to_vmem [thread:$0]  (!%p1173_p10), %s167_s5, 1024, %s169_s9, [#allocation6], %s1402_s6, %s1402_s6, %s1403_s7  }
  0x14   : > { %p35_p12 = scmp.ne.s32.totalorder %s1395_s17, %s1391_s16  ;;  %p26_p13 = scmp.eq.s32.totalorder %s25_s12, 0 }
  0x15   : > { %p36_p0 = scmp.eq.s32.totalorder %s1399_s18, 0  ;;  %p1189_p5 = scmp.lt.s32.totalorder %s1399_s18, 2 }
  0x16   : > { %p1504_p3 = por %p128_p2, %p35_p12  ;;  %s185_s20 = sand.u32 1, %s1395_s17  }
  0x17   : > { %s1510_s14 = scalar_select %p26_p13, %s1395_s17, %s28_s11  }
  0x18   : > { %p37_p7 = por %p36_p0, %p35_p12  ;;  %s1062_s23 = sshll.u32 %s185_s20, 7 }
  0x19   : > { %s1136_s24 = sshll.u32 %s1399_s18, 7  ;;  %s189_s29 = scalar_lea.vmem [#allocation2], %s1062_s23 }
  0x1a   : > { %s195_s28 = scalar_lea.hbm %s1868_s0, %s1136_s24  ;;  %s198_s30 = sshll.u32 %s189_s29, 4  ;;  %s199_s30 = int_to_ptr.vmem [resolvable:$true] %s198_s30 }
  0x1b   : > { %s196_s5 = sshll.u32 %s195_s28, 4  ;;  %p1517_p2 = pnand %p1189_p5, %p37_p7  ;;  %s197_s5 = int_to_ptr.hbm [resolvable:$true] %s196_s5 }
  0x1c   : > { %s186_s7 = scalar_lea.sflag [#allocation3], %s185_s20  ;;  %s1299_s8 = sshra.s32 %s197_s5, 4  ;;  %s1300_s8 = int_to_ptr.hbm [resolvable:$true] %s1299_s8 }
  0x1d   : > { %s1301_s9 = scalar_lea.hbm %s1300_s8, 128  ;;  %p1303_p10 = pneg %p1517_p2 }
  0x1e   : > { %p1302_p9 = scmp.ne.s32.totalorder %s1300_s8, %s1301_s9  ;;  %s1306_s23 = scalar_lea.hbm %s1868_s0, 256 }
  0x1f   : > { %p1307_p0 = scmp.lt.s32.totalorder %s1300_s8, %s1868_s0  ;;  %p1308_p5 = scmp.lt.s32.totalorder %s1306_s23, %s1301_s9 }
  0x20   : > { %p1304_p12 = pnand %p1303_p10, %p1302_p9 }
  0x21   : > { %p1309_p7 = por %p1308_p5, %p1307_p0 }
  0x22   : > { %p1305_p13 = pneg %p1304_p12 }
  0x24   : > { %p1310_p11 = pnand %p1309_p7, %p1305_p13 }
  0x26   : > { %1313 = shalt.err (!%p1310_p11)
}
  0x27   : > { %s1405_s20 = smov 128   ;;  %s1406_s27 = smov 8  }
  0x28   : > { %1182 = dma.hbm_to_vmem [thread:$0]  (!%p1517_p2), %s197_s5, 2048, %s199_s30, %s186_s7, %s1405_s20, %s1405_s20, %s1406_s27  }
  0x29   : > { %210 = sbr.rel (%p1481_p8) target bundleno = 559 (0x22f), region = 36  ;;  %s1534_s28 = sand.u32 (!%p1481_p8), 1, %s1391_s16  }
  0x2a   : > { %s1067_s29 = sshll.u32 (!%p1481_p8), %s1534_s28, 7  ;;  %s213_s8 = scalar_lea.sflag (!%p1481_p8), [#allocation3], %s1534_s28 }
  0x2b   : > { %s1538_s9 = scalar_lea.vmem (!%p1481_p8), [#allocation2], %s1067_s29 }
  0x2e   : > { %1374 = dma.done.wait (%p1468_p4), %s213_s8, 2048  }
  0x2f   : > { %1376 = vsyncadd (%p1468_p4), %s213_s8, 4294965248 }
  0x30   : > { %1378 = dma.done.wait (%p42_p1), [#allocation6], 1664  }
  0x31   : > { %1380 = vsyncadd (%p42_p1), [#allocation6], 4294965632  ;;  %v260_v0 = vld [vmem:[%s1538_s9 + $0x30] sm:$0xff]  ;;  %v261_v1 = vld [vmem:[%s1538_s9 + $0x38] sm:$0xff]  ;;  %vm415_vm0 = vcmask 1046528   ;;  %vm503_vm1 = vcmask 1045504  }
  0x32   : > { %v262_v2 = vld [vmem:[%s1538_s9 + $0x40] sm:$0xff]  ;;  %v263_v3 = vld [vmem:[%s1538_s9 + $0x48] sm:$0xff]  ;;  %v276_v4 = vpack.c.bf16 %v260_v0, %v260_v0  ;;  %v277_v5 = vpack.c.bf16 %v261_v1, %v261_v1  ;;  %v256_v10 = vld [vmem:[%s1538_s9 + $0x10] sm:$0xff]  ;;  %vm330_vm2 = vsmask.f32 7424  ;;  %s1407_s21 = smov 32  }
  0x33   : > { %v278_v6 = vpack.c.bf16 %v262_v2, %v262_v2  ;;  %v254_v7 = vld [vmem:[%s1538_s9] sm:$0xff]  ;;  %v255_v8 = vld [vmem:[%s1538_s9 + $0x8] sm:$0xff]  ;;  %v279_v9 = vpack.c.bf16 %v263_v3, %v263_v3  ;;  %v257_v11 = vld [vmem:[%s1538_s9 + $0x18] sm:$0xff]  ;;  %v272_v17 = vpack.c.bf16 %v256_v10, %v256_v10  ;;  %s1408_s26 = smov 64   ;;  %vm449_vm3 = vsmask.f32 6400 }
  0x34   : > { %v270_v12 = vpack.c.bf16 %v254_v7, %v254_v7  ;;  %v271_v13 = vpack.c.bf16 %v255_v8, %v255_v8  ;;  %v309_v14 = vunpack.c.l.b16 %v276_v4  ;;  %v310_v15 = vunpack.c.l.b16 %v277_v5  ;;  %v264_v18 = vld [vmem:[%s1538_s9 + $0x50] sm:$0xff]  ;;  %v265_v23 = vld [vmem:[%s1538_s9 + $0x58] sm:$0xff]  ;;  %v266_v46 = vld [vmem:[%s1538_s9 + $0x60] sm:$0xff]  ;;  %s1409_s30 = smov 16   ;;  %s1410_s5 = smov 48  }
  0x35   : > { %v311_v16 = vunpack.c.l.b16 %v278_v6  ;;  %v312_v19 = vunpack.c.l.b16 %v279_v9  ;;  %v273_v20 = vpack.c.bf16 %v257_v11, %v257_v11  ;;  %v305_v25 = vunpack.c.l.b16 %v272_v17  ;;  %v267_v61 = vld [vmem:[%s1538_s9 + $0x68] sm:$0xff]  ;;  %v268_v62 = vld [vmem:[%s1538_s9 + $0x70] sm:$0xff]  ;;  %v269_v63 = vld [vmem:[%s1538_s9 + $0x78] sm:$0xff]  ;;  %s1070_s11 = sshll.u32 %s1534_s28, 3  ;;  %s1132_s12 = sshll.u32 %s1459_s19, 3 }
  0x36   : > { %v303_v21 = vunpack.c.l.b16 %v270_v12  ;;  %v304_v22 = vunpack.c.l.b16 %v271_v13  ;;  %v1558_v24 = vpack.c.b16 %v310_v15, %v309_v14  ;;  %v280_v29 = vpack.c.bf16 %v264_v18, %v264_v18  ;;  %v258_v10 = vld [vmem:[%s1538_s9 + $0x20] sm:$0xff]  ;;  %v259_v11 = vld [vmem:[%s1538_s9 + $0x28] sm:$0xff]  ;;  %s963_s27 = scalar_lea.hbm %s1872_s4, %s1132_s12  ;;  %s251_s29 = scalar_lea.vmem [#allocation8], %s1070_s11 }
  0x37   : > { %v1560_v26 = vpack.c.b16 %v312_v19, %v311_v16  ;;  %v306_v27 = vunpack.c.l.b16 %v273_v20  ;;  %v281_v33 = vpack.c.bf16 %v265_v23, %v265_v23  ;;  %v282_v56 = vpack.c.bf16 %v266_v46, %v266_v46  ;;  %s965_s8 = sshll.u32 %s251_s29, 4  ;;  %s967_s9 = sshll.u32 %s963_s27, 4  ;;  %s966_s8 = int_to_ptr.vmem [resolvable:$true] %s965_s8  ;;  %s968_s9 = int_to_ptr.hbm [resolvable:$true] %s967_s9 }
  0x38   : > { %v1562_v28 = vpack.c.b16 %v304_v22, %v303_v21  ;;  %v421_v30 = vrot.slane %v1558_v24, 1  ;;  %v355_v31 = vshll.u32 %v1558_v24, 16  ;;  %v359_v32 = vshrl.u32 %v1558_v24, 16  ;;  %s1343_s19 = sshra.s32 %s968_s9, 4  ;;  %s1349_s6 = scalar_lea.hbm %s1872_s4, 16  ;;  %s1344_s19 = int_to_ptr.hbm [resolvable:$true] %s1343_s19 }
  0x39   : > { %v423_v34 = vrot.slane %v1560_v26, 1  ;;  %v1568_v35 = vpack.c.b16 %v306_v27, %v305_v25  ;;  %v363_v37 = vshll.u32 %v1560_v26, 16  ;;  %v367_v39 = vshrl.u32 %v1560_v26, 16  ;;  %p1350_p11 = scmp.lt.s32.totalorder %s1344_s19, %s1872_s4 }
  0x3a   : > { %v504_v36 = vrot.slane %v1562_v28, 2  ;;  %v1572_v38 = vrot.slane %v355_v31, 1  ;;  %v461_v40 = vrot.slane %v359_v32, 1  ;;  %v509_v41 = vrot.slane %v1558_v24, 2 }
  0x3b   : > { %v424_v42 = vsel %vm415_vm0, %v421_v30, %v423_v34  ;;  %v505_v43 = vrot.slane %v1568_v35, 2  ;;  %v462_v44 = vrot.slane %v355_v31, 2  ;;  %v466_v45 = vrot.slane %v363_v37, 2 }
  0x3c   : > { %439 = vrot.lane.b32.xlu0 %v424_v42, %s1407_s21  ;;  %v361_v47 = vor.u32 %v359_v32, %v1572_v38  ;;  %v365_v48 = vrot.slane %v363_v37, 1  ;;  %v465_v49 = vrot.slane %v367_v39, 1  ;;  %v332_v50 = vshrl.u32 %v1562_v28, 16 }
  0x3d   : > { %v506_v51 = vsel %vm503_vm1, %v504_v36, %v505_v43  ;;  %v334_v52 = vshll.u32 %v1562_v28, 16  ;;  %v339_v53 = vshll.u32 %v1568_v35, 16  ;;  %v343_v54 = vshrl.u32 %v1568_v35, 16 }
  0x3e   : > { %521 = vrot.lane.b32.xlu1 %v506_v51, %s1408_s26  ;;  %v511_v55 = vrot.slane %v1560_v26, 2  ;;  %v1596_v57 = vor.u32 %v462_v44, %v461_v40  ;;  %v1598_v58 = vor.u32 %v466_v45, %v465_v49  ;;  %v450_v59 = vrot.slane %v332_v50, 1 }
  0x3f   : > { %v451_v60 = vrot.slane %v334_v52, 2  ;;  %v366_v0 = vsel %vm330_vm2, %v361_v47, %v365_v48  ;;  %v453_v2 = vrot.slane %v343_v54, 1  ;;  %v454_v3 = vrot.slane %v339_v53, 2 }
  0x40   : > { %v512_v1 = vsel %vm503_vm1, %v509_v41, %v511_v55  ;;  %v313_v4 = vunpack.c.l.b16 %v280_v29  ;;  %v314_v5 = vunpack.c.l.b16 %v281_v33  ;;  %v283_v6 = vpack.c.bf16 %v267_v61, %v267_v61 }
  0x41   : > { %527 = vrot.lane.b32.xlu2 %v512_v1, %s1408_s26  ;;  %v284_v7 = vpack.c.bf16 %v268_v62, %v268_v62  ;;  %v285_v8 = vpack.c.bf16 %v269_v63, %v269_v63  ;;  %v315_v9 = vunpack.c.l.b16 %v282_v56  ;;  %v468_v12 = vsel %vm449_vm3, %v1596_v57, %v1598_v58 }
  0x42   : > { %v452_v13 = vor.u32 %v451_v60, %v450_v59  ;;  %v336_v14 = vrot.slane %v334_v52, 1  ;;  %v416_v15 = vrot.slane %v1562_v28, 1  ;;  %v316_v16 = vunpack.c.l.b16 %v283_v6 }
  0x43   : > { %v317_v17 = vunpack.c.l.b16 %v284_v7  ;;  %v318_v18 = vunpack.c.l.b16 %v285_v8  ;;  %v417_v19 = vrot.slane %v1568_v35, 1  ;;  %v1620_v20 = vor.u32 %v454_v3, %v453_v2 }
  0x44   : > { %405 = vrot.lane.b32.xlu0 %v366_v0, %s1409_s30  ;;  %v1622_v21 = vpack.c.b16 %v314_v5, %v313_v4  ;;  %v274_v22 = vpack.c.bf16 %v258_v10, %v258_v10  ;;  %v275_v23 = vpack.c.bf16 %v259_v11, %v259_v11  ;;  %v1625_v25 = vpack.c.b16 %v316_v16, %v315_v9 }
  0x45   : > { %v418_v27 = vsel %vm415_vm0, %v416_v15, %v417_v19  ;;  %v337_v29 = vor.u32 %v336_v14, %v332_v50  ;;  %v341_v31 = vrot.slane %v339_v53, 1  ;;  %v1630_v32 = vpack.c.b16 %v318_v18, %v317_v17 }
  0x46   : > { %493 = vrot.lane.b32.xlu1 %v468_v12, %s1410_s5  ;;  %v371_v33 = vshll.u32 %v1622_v21, 16  ;;  %v379_v36 = vshll.u32 %v1625_v25, 16  ;;  %v456_v37 = vsel %vm449_vm3, %v452_v13, %v1620_v20  ;;  %v307_v40 = vunpack.c.l.b16 %v274_v22 }
  0x47   : > { %v308_v42 = vunpack.c.l.b16 %v275_v23  ;;  %v369_v44 = vor.u32 %v367_v39, %v365_v48  ;;  %v342_v46 = vsel %vm330_vm2, %v337_v29, %v341_v31  ;;  %v383_v49 = vshrl.u32 %v1625_v25, 16 }
  0x48   : > { %v373_v45 = vrot.slane %v371_v33, 1  ;;  %v1640_v47 = vrot.slane %v379_v36, 1  ;;  %v387_v50 = vshll.u32 %v1630_v32, 16  ;;  %v425_v51 = vrot.slane %v1622_v21, 1 }
  0x49   : > { %433 = vrot.lane.b32.xlu2 %v418_v27, %s1407_s21  ;;  %v1646_v52 = vpack.c.b16 %v308_v42, %v307_v40  ;;  %v375_v53 = vshrl.u32 %v1622_v21, 16  ;;  %v470_v48 = vrot.slane %v371_v33, 2  ;;  %v345_v1 = vor.u32 %v343_v54, %v341_v31 }
  0x4a   : > { %v374_v39 = vsel %vm330_vm2, %v369_v44, %v373_v45  ;;  %v385_v56 = vor.u32 %v383_v49, %v1640_v47  ;;  %v389_v59 = vrot.slane %v387_v50, 1  ;;  %v426_v61 = vsel %vm415_vm0, %v423_v34, %v425_v51 }
  0x4b   : > { %v469_v60 = vrot.slane %v375_v53, 1  ;;  %v347_v62 = vshll.u32 %v1646_v52, 16  ;;  %v427_v3 = vrot.slane %v1625_v25, 1  ;;  %v429_v4 = vrot.slane %v1630_v32, 1 }
  0x4c   : > { %487 = vrot.lane.b32.xlu0 %v456_v37, %s1410_s5  ;;  %v390_v0 = vsel %vm330_vm2, %v385_v56, %v389_v59  ;;  %v391_v5 = vshrl.u32 %v1630_v32, 16  ;;  %v473_v7 = vrot.slane %v383_v49, 1  ;;  %v513_v54 = vrot.slane %v1622_v21, 2 }
  0x4d   : > { %v1659_v63 = vor.u32 %v470_v48, %v469_v60  ;;  %v349_v2 = vrot.slane %v347_v62, 1  ;;  %v351_v8 = vshrl.u32 %v1646_v52, 16  ;;  %v430_v9 = vsel %vm415_vm0, %v427_v3, %v429_v4 }
  0x4e   : > { %399 = vrot.lane.b32.xlu1 %v342_v46, %s1409_s30  ;;  %v474_v10 = vrot.slane %v379_v36, 2  ;;  %v477_v11 = vrot.slane %v391_v5, 1  ;;  %v419_v12 = vrot.slane %v1646_v52, 1  ;;  %v514_v13 = vsel %vm503_vm1, %v511_v55, %v513_v54 }
  0x4f   : > { %v472_v34 = vsel %vm449_vm3, %v1598_v58, %v1659_v63  ;;  %v350_v6 = vsel %vm330_vm2, %v345_v1, %v349_v2  ;;  %v478_v58 = vrot.slane %v387_v50, 2  ;;  %v457_v14 = vrot.slane %v351_v8, 1 }
  0x50   : > { %v458_v15 = vrot.slane %v347_v62, 2  ;;  %v422_v16 = vsel %vm415_vm0, %v419_v12, %v421_v30  ;;  %v475_v17 = vor.u32 %v474_v10, %v473_v7  ;;  %v420_v22 = vsel %vm415_vm0, %v417_v19, %v419_v12 }
  0x51   : > { %407 = vrot.lane.b32.xlu2 %v374_v39, %s1409_s30  ;;  %v479_v18 = vor.u32 %v478_v58, %v477_v11  ;;  %v1411_v29 = vmov 0.0|0.0   ;;  %v515_v55 = vrot.slane %v1625_v25, 2  ;;  %v517_v33 = vrot.slane %v1630_v32, 2 }
  0x52   : > { %v459_v23 = vor.u32 %v458_v15, %v457_v14  ;;  %v328_v31 = vunpack.c.l.b16 %v1411_v29  ;;  %v507_v19 = vrot.slane %v1646_v52, 2  ;;  %v377_v40 = vor.u32 %v375_v53, %v373_v45  ;;  %v1141_v45 = vld [vmem:[#allocation5 + $0x20] sm:$0xff] }
  0x53   : > { %v480_v27 = vsel %vm449_vm3, %v475_v17, %v479_v18  ;;  %v518_v37 = vsel %vm503_vm1, %v515_v55, %v517_v33  ;;  %v393_v50 = vor.u32 %v391_v5, %v389_v59  ;;  %1150 = vmatpush.bf16.msra.mxu2 %v1141_v45  ;;  %665 = vmatpush.bf16.msra.mxu0 %v1141_v45  ;;  %vm537_vm4 = vcmask 130048  }
  0x54   : > { %441 = vrot.lane.b32.xlu0 %v426_v61, %s1407_s21  ;;  %v460_v30 = vsel %vm449_vm3, %v1620_v20, %v459_v23  ;;  %v329_v36 = vpack.c.b16 %v328_v31, %v328_v31  ;;  %v508_v42 = vsel %vm503_vm1, %v505_v43, %v507_v19  ;;  %v510_v46 = vsel %vm503_vm1, %v507_v19, %v509_v41  ;;  %v1140_v61 = vld [vmem:[#allocation5 + $0x18] sm:$0xff] }
  0x55   : > { %v382_v20 = vsel %vm330_vm2, %v377_v40, %v1640_v47  ;;  %v464_v49 = vsel %vm449_vm3, %v459_v23, %v1596_v57  ;;  %v428_v43 = vsel %vm415_vm0, %v425_v51, %v427_v3  ;;  %1151 = vmatpush.bf16.msra.mxu3 %v1141_v45  ;;  %v353_v47 = vor.u32 %v351_v8, %v349_v2  ;;  %v1139_v2 = vld [vmem:[#allocation5 + $0x10] sm:$0xff]  ;;  %v1137_v3 = vld [vmem:[#allocation5] sm:$0xff] }
  0x56   : > { %411 = vrot.lane.b32.xlu1 %v390_v0, %s1409_s30  ;;  %v395_v44 = vshll.u32 %v329_v36, 16  ;;  %v476_v57 = vsel %vm449_vm3, %v1659_v63, %v475_v17  ;;  %v431_v39 = vrot.slane %v329_v36, 1  ;;  %v481_v48 = vshrl.u32 %v329_v36, 16 }
  0x57   : > { %v358_v56 = vsel %vm330_vm2, %v353_v47, %v1572_v38  ;;  %1152 = vmatpush.bf16.msra.mxu2 %v1140_v61  ;;  %666 = vmatpush.bf16.msra.mxu0 %v1140_v61  ;;  %v516_v62 = vsel %vm503_vm1, %v513_v54, %v515_v55  ;;  %v519_v0 = vrot.slane %v329_v36, 2  ;;  %vm554_vm5 = vcmask 261120  }
  0x58   : > { %v397_v53 = vrot.slane %v395_v44, 1  ;;  %v432_v51 = vsel %vm415_vm0, %v429_v4, %v431_v39  ;;  %v483_v59 = vrot.slane %v481_v48, 1  ;;  %v484_v60 = vrot.slane %v395_v44, 2 }
  0x59   : > { %495 = vrot.lane.b32.xlu2 %v472_v34, %s1410_s5  ;;  %1153 = vmatpush.bf16.msra.mxu3 %v1140_v61  ;;  %v520_v1 = vsel %vm503_vm1, %v517_v33, %v519_v0  ;;  %v1138_v34 = vld [vmem:[#allocation5 + $0x8] sm:$0xff]  ;;  %vm571_vm6 = vcmask 392192   ;;  %vm588_vm7 = vcmask 523264   ;;  %vm645_vm8 = vcmask 654336  }
  0x5a   : > { %v398_v41 = vsel %vm330_vm2, %v393_v50, %v397_v53  ;;  %v485_v63 = vor.u32 %v484_v60, %v483_v59  ;;  %vm867_vm2 = vcmask 1041409  }
  0x5b   : > { %1154 = vmatpush.bf16.msra.mxu2 %v1139_v2  ;;  %667 = vmatpush.bf16.msra.mxu0 %v1139_v2 }
  0x5c   : > { %401 = vrot.lane.b32.xlu0 %v350_v6, %s1409_s30  ;;  %v486_v38 = vsel %vm449_vm3, %v479_v18, %v485_v63  ;;  %vm870_vm3 = vcmask 1042434  }
  0x5d   : > { %1155 = vmatpush.bf16.msra.mxu3 %v1139_v2 }
  0x5e   : > { %445 = vrot.lane.b32.xlu1 %v430_v9, %s1407_s21 }
  0x5f   : > { %1156 = vmatpush.bf16.msra.mxu2 %v1138_v34  ;;  %668 = vmatpush.bf16.msra.mxu0 %v1138_v34 }
  0x61   : > { %529 = vrot.lane.b32.xlu2 %v514_v13, %s1408_s26  ;;  %1157 = vmatpush.bf16.msra.mxu3 %v1138_v34 }
  0x63   : > { %1158 = vmatpush.bf16.msra.mxu2 %v1137_v3  ;;  %669 = vmatpush.bf16.msra.mxu0 %v1137_v3 }
  0x64   : > { %435 = vrot.lane.b32.xlu0 %v420_v22, %s1407_s21 }
  0x65   : > { %1159 = vmatpush.bf16.msra.mxu3 %v1137_v3 }
  0x66   : > { %499 = vrot.lane.b32.xlu1 %v480_v27, %s1410_s5 }
  0x69   : > { %489 = vrot.lane.b32.xlu2 %v460_v30, %s1410_s5 }
  0x6c   : > { %533 = vrot.lane.b32.xlu0 %v518_v37, %s1408_s26 }
  0x6e   : > { %523 = vrot.lane.b32.xlu1 %v508_v42, %s1408_s26 }
  0x71   : > { %409 = vrot.lane.b32.xlu2 %v382_v20, %s1409_s30 }
  0x74   : > { %443 = vrot.lane.b32.xlu0 %v428_v43, %s1407_s21 }
  0x76   : > { %413 = vrot.lane.b32.xlu1 %v398_v41, %s1409_s30 }
  0x79   : > { %497 = vrot.lane.b32.xlu2 %v476_v57, %s1410_s5 }
  0x7c   : > { %403 = vrot.lane.b32.xlu0 %v358_v56, %s1409_s30 }
  0x7e   : > { %447 = vrot.lane.b32.xlu1 %v432_v51, %s1407_s21 }
  0x81   : > { %531 = vrot.lane.b32.xlu2 %v516_v62, %s1408_s26 }
  0x84   : > { %437 = vrot.lane.b32.xlu0 %v422_v16, %s1407_s21  ;;  %s953_s21 = scalar_lea.sflag [#allocation4], %s1534_s28 }
  0x86   : > { %501 = vrot.lane.b32.xlu1 %v486_v38, %s1410_s5 }
  0x89   : > { %491 = vrot.lane.b32.xlu2 %v464_v49, %s1410_s5 }
  0x8c   : > { %535 = vrot.lane.b32.xlu0 %v520_v1, %s1408_s26 }
  0x8e   : > { %525 = vrot.lane.b32.xlu1 %v510_v46, %s1408_s26  ;;  %s1345_s26 = scalar_lea.hbm %s1344_s19, 8 }
  0x8f   : > { %p1346_p1 = scmp.ne.s32.totalorder %s1344_s19, %s1345_s26  ;;  %p1351_p2 = scmp.lt.s32.totalorder %s1349_s6, %s1345_s26 }
  0x91   : > { %p1347_p4 = pnand %p1346_p1, %p1504_p3  ;;  %p1352_p9 = por %p1351_p2, %p1350_p11 }
  0x93   : > { %p1348_p8 = pneg %p1347_p4 }
  0x95   : > { %p1353_p10 = pnand %p1352_p9, %p1348_p8 }
  0x9b   : > { %v528_v4 = vpop.permute.xlu2 %527 }
  0xa3   : > { %v434_v5 = vpop.permute.xlu2 %433 }
  0xab   : > { %v408_v6 = vpop.permute.xlu2 %407 }
  0xac   : > { %v547_v22 = vsel %vm537_vm4, %v1560_v26, %v408_v6 }
  0xae   : > { %v440_v7 = vpop.permute.xlu0 %439 }
  0xb0   : > { %v522_v54 = vpop.permute.xlu1 %521 }
  0xb3   : > { %v496_v8 = vpop.permute.xlu2 %495 }
  0xb6   : > { %v406_v9 = vpop.permute.xlu0 %405 }
  0xb7   : > { %v545_v10 = vsel %vm537_vm4, %v1558_v24, %v406_v9 }
  0xb8   : > { %v562_v11 = vsel %vm554_vm5, %v545_v10, %v440_v7  ;;  %v494_v58 = vpop.permute.xlu1 %493 }
  0xb9   : > { %v579_v12 = vsel %vm571_vm6, %v562_v11, %v494_v58  ;;  %v1412_v11 = vmov 16  }
  0xba   : > { %v596_v13 = vsel %vm588_vm7, %v579_v12, %v528_v4 }
  0xbb   : > { %1094 = vmatmul.msk.bf16.vlgmr.msra.gmra.mxu2 %vm645_vm8, %v596_v13  ;;  %v530_v15 = vpop.permute.xlu2 %529 }
  0xbe   : > { %v488_v14 = vpop.permute.xlu0 %487 }
  0xc0   : > { %v400_v16 = vpop.permute.xlu1 %399 }
  0xc1   : > { %v539_v17 = vsel %vm537_vm4, %v1562_v28, %v400_v16 }
  0xc2   : > { %v556_v18 = vsel %vm554_vm5, %v539_v17, %v434_v5  ;;  %v1149_v17 = vld [vmem:[#allocation7 + $0x38] sm:$0xff] }
  0xc3   : > { %v573_v24 = vsel %vm571_vm6, %v556_v18, %v488_v14  ;;  %v490_v33 = vpop.permute.xlu2 %489  ;;  %937 = vmatpush.bf16.msra.mxu1 %v1149_v17 }
  0xc4   : > { %v590_v23 = vsel %vm588_vm7, %v573_v24, %v522_v54  ;;  %v711_v54 = vlaneseq }
  0xc5   : > { %1091 = vmatmul.msk.bf16.vlgmr.msra.gmra.mxu0 %vm645_vm8, %v590_v23 }
  0xc6   : > { %v442_v27 = vpop.permute.xlu0 %441  ;;  %v715_v9 = vand.u32 127, %v711_v54  ;;  %v712_v13 = vshrl.u32 %v711_v54, 7  ;;  %v1142_v54 = vld [vmem:[#allocation7] sm:$0xff] }
  0xc7   : > { %v564_v29 = vsel %vm554_vm5, %v547_v22, %v442_v27 }
  0xc8   : > { %v412_v31 = vpop.permute.xlu1 %411  ;;  %v581_v55 = vsel %vm571_vm6, %v564_v29, %v496_v8  ;;  %vm717_vm9 = vcmp.lt.s32.totalorder %v715_v9, 32  ;;  %vm720_vm10 = vcmp.ge.s32.totalorder %v715_v9, 32  ;;  %vm721_vm11 = vcmp.lt.s32.totalorder %v715_v9, 64  ;;  %v1148_v29 = vld [vmem:[#allocation7 + $0x30] sm:$0xff] }
  0xc9   : > { %v598_v28 = vsel %vm588_vm7, %v581_v55, %v530_v15  ;;  %v551_v40 = vsel %vm537_vm4, %v1625_v25, %v412_v31  ;;  %v719_v58 = vsel %vm717_vm9, 14, %v1412_v11  ;;  %vm722_vm12 = vmand %vm720_vm10, %vm721_vm11  ;;  %vm724_vm13 = vcmp.ge.s32.totalorder %v715_v9, 64  ;;  %938 = vmatpush.bf16.msra.mxu1 %v1148_v29 }
  0xca   : > { %vm725_vm14 = vcmp.lt.s32.totalorder %v715_v9, 96  ;;  %v723_v15 = vsel %vm722_vm12, 13, %v719_v58  ;;  %v713_v16 = vadd.s32 8, %v712_v13 }
  0xcb   : > { %1095 = vmatmul.msk.bf16.gmra.mxu2 %vm645_vm8, %v598_v28  ;;  %v410_v36 = vpop.permute.xlu2 %409  ;;  %vm726_vm15 = vmand %vm724_vm13, %vm725_vm14 }
  0xcc   : > { %v727_v24 = vsel %vm726_vm15, 12, %v723_v15 }
  0xcd   : > { %vm1788_vm0 = vcmp.lt.s32.totalorder %v713_v16, %v727_v24  ;;  %vm1794_vm1 = vcmp.lt.s32.totalorder %v712_v13, %v727_v24 }
  0xce   : > { %v402_v30 = vpop.permute.xlu0 %401 }
  0xcf   : > { %v541_v42 = vsel %vm537_vm4, %v1568_v35, %v402_v30  ;;  %v549_v35 = vsel %vm537_vm4, %v1622_v21, %v410_v36 }
  0xd0   : > { %v446_v19 = vpop.permute.xlu1 %445 }
  0xd1   : > { %v568_v46 = vsel %vm554_vm5, %v551_v40, %v446_v19  ;;  %v1147_v19 = vld [vmem:[#allocation7 + $0x28] sm:$0xff] }
  0xd2   : > { %939 = vmatpush.bf16.msra.mxu1 %v1147_v19 }
  0xd3   : > { %v498_v44 = vpop.permute.xlu2 %497 }
  0xd6   : > { %v436_v37 = vpop.permute.xlu0 %435 }
  0xd7   : > { %v558_v20 = vsel %vm554_vm5, %v541_v42, %v436_v37 }
  0xd8   : > { %v500_v26 = vpop.permute.xlu1 %499  ;;  %v575_v43 = vsel %vm571_vm6, %v558_v20, %v490_v33 }
  0xd9   : > { %v585_v49 = vsel %vm571_vm6, %v568_v46, %v500_v26 }
  0xdb   : > { %v532_v47 = vpop.permute.xlu2 %531 }
  0xde   : > { %v534_v45 = vpop.permute.xlu0 %533 }
  0xdf   : > { %v602_v50 = vsel %vm588_vm7, %v585_v49, %v534_v45 }
  0xe0   : > { %v524_v53 = vpop.permute.xlu1 %523  ;;  %1097 = vmatmul.msk.bf16.vlgmr.msra.gmra.mxu3 %vm645_vm8, %v602_v50  ;;  %v1146_v50 = vld [vmem:[#allocation7 + $0x20] sm:$0xff] }
  0xe1   : > { %v592_v25 = vsel %vm588_vm7, %v575_v43, %v524_v53  ;;  %940 = vmatpush.bf16.msra.mxu1 %v1146_v50 }
  0xe2   : > { %1092 = vmatmul.msk.bf16.gmra.mxu0 %vm645_vm8, %v592_v25 }
  0xe3   : > { %v492_v60 = vpop.permute.xlu2 %491 }
  0xe6   : > { %v444_v41 = vpop.permute.xlu0 %443 }
  0xe7   : > { %v566_v57 = vsel %vm554_vm5, %v549_v35, %v444_v41 }
  0xe8   : > { %v414_v39 = vpop.permute.xlu1 %413  ;;  %v583_v48 = vsel %vm571_vm6, %v566_v57, %v498_v44 }
  0xe9   : > { %v600_v56 = vsel %vm588_vm7, %v583_v48, %v532_v47  ;;  %v553_v21 = vsel %vm537_vm4, %v1630_v32, %v414_v39 }
  0xea   : > { %1096 = vmatmul.msk.bf16.gmra.mxu2 %vm645_vm8, %v600_v56  ;;  %v1145_v56 = vld [vmem:[#allocation7 + $0x18] sm:$0xff] }
  0xeb   : > { %941 = vmatpush.bf16.msra.mxu1 %v1145_v56 }
  0xee   : > { %v404_v51 = vpop.permute.xlu0 %403 }
  0xef   : > { %v543_v61 = vsel %vm537_vm4, %v1646_v52, %v404_v51  ;;  %vm873_vm4 = vcmask 1043459  }
  0xf0   : > { %v448_v59 = vpop.permute.xlu1 %447 }
  0xf1   : > { %v570_v38 = vsel %vm554_vm5, %v553_v21, %v448_v59 }
  0xf6   : > { %v438_v62 = vpop.permute.xlu0 %437 }
  0xf7   : > { %v560_v63 = vsel %vm554_vm5, %v543_v61, %v438_v62  ;;  %vm876_vm5 = vcmask 1044484  }
  0xf8   : > { %v502_v0 = vpop.permute.xlu1 %501  ;;  %v577_v1 = vsel %vm571_vm6, %v560_v63, %v492_v60  ;;  %v1144_v63 = vld [vmem:[#allocation7 + $0x10] sm:$0xff] }
  0xf9   : > { %v587_v2 = vsel %vm571_vm6, %v570_v38, %v502_v0  ;;  %942 = vmatpush.bf16.msra.mxu1 %v1144_v63  ;;  %vm879_vm6 = vcmask 1045509  }
  0xfe   : > { %v536_v34 = vpop.permute.xlu0 %535 }
  0xff   : > { %v604_v3 = vsel %vm588_vm7, %v587_v2, %v536_v34  ;;  %v1143_v34 = vld [vmem:[#allocation7 + $0x8] sm:$0xff] }
 0x100   : > { %v526_v4 = vpop.permute.xlu1 %525  ;;  %1098 = vmatmul.msk.bf16.gmra.mxu3 %vm645_vm8, %v604_v3  ;;  %943 = vmatpush.bf16.msra.mxu1 %v1143_v34 }
 0x101   : > { %v594_v52 = vsel %vm588_vm7, %v577_v1, %v526_v4  ;;  %vm882_vm7 = vcmask 1046534  }
 0x102   : > { %1093 = vmatmul.msk.bf16.gmra.mxu0 %vm645_vm8, %v594_v52  ;;  %vm885_vm8 = vcmask 1047559  }
 0x104   : > { %944 = vmatpush.bf16.msra.mxu1 %v1142_v54 }
 0x13e   : > { %v686_v32 = vpop.f32.mrf.mxu2 }
 0x13f   : > { %v740_v37 = vsel %vm1794_vm1, %v686_v32, -inf }
 0x142   : > { %v671_v5 = vpop.f32.mrf.mxu0 }
 0x143   : > { %v734_v20 = vsel %vm1794_vm1, %v671_v5, -inf }
 0x146   : > { %v688_v6 = vpop.f32.mrf.mxu2 }
 0x147   : > { %v741_v28 = vsel %vm1788_vm0, %v688_v6, -inf }
 0x148   : > { %v771_v40 = vmax.f32 %v740_v37, %v741_v28 }
 0x14a   : > { %v673_v7 = vpop.f32.mrf.mxu0  ;;  %v772_v57 = vrot.slane %v771_v40, 4 }
 0x14b   : > { %v735_v26 = vsel %vm1788_vm0, %v673_v7, -inf }
 0x14c   : > { %v750_v53 = vmax.f32 %v734_v20, %v735_v26  ;;  %v773_v61 = vmax.f32 %v771_v40, %v772_v57 }
 0x14e   : > { %v691_v8 = vpop.f32.mrf.mxu2  ;;  %v751_v51 = vrot.slane %v750_v53, 4  ;;  %v774_v3 = vrot.slane %v773_v61, 2 }
 0x14f   : > { %v742_v42 = vsel %vm1794_vm1, %v691_v8, -inf }
 0x150   : > { %v752_v38 = vmax.f32 %v750_v53, %v751_v51  ;;  %v775_v8 = vmax.f32 %v773_v61, %v774_v3 }
 0x152   : > { %v753_v32 = vrot.slane %v752_v38, 2 }
 0x154   : > { %v754_v11 = vmax.f32 %v752_v38, %v753_v32 }
 0x156   : > { %v693_v12 = vpop.f32.mrf.mxu2 }
 0x157   : > { %v743_v36 = vsel %vm1788_vm0, %v693_v12, -inf }
 0x158   : > { %v778_v49 = vmax.f32 %v742_v42, %v743_v36 }
 0x15a   : > { %v779_v48 = vrot.slane %v778_v49, 4 }
 0x15c   : > { %v780_v21 = vmax.f32 %v778_v49, %v779_v48 }
 0x15e   : > { %v781_v52 = vrot.slane %v780_v21, 2 }
 0x15f   : > { %v676_v10 = vpop.f32.mrf.mxu0 }
 0x160   : > { %v736_v55 = vsel %vm1794_vm1, %v676_v10, -inf  ;;  %v782_v10 = vmax.f32 %v780_v21, %v781_v52 }
 0x163   : > { %v701_v14 = vpop.f32.mrf.mxu3 }
 0x164   : > { %v746_v43 = vsel %vm1794_vm1, %v701_v14, -inf  ;;  %v776_v14 = vrot.slane %v775_v8, 1 }
 0x167   : > { %v678_v18 = vpop.f32.mrf.mxu0 }
 0x168   : > { %v737_v23 = vsel %vm1788_vm0, %v678_v18, -inf  ;;  %v783_v18 = vrot.slane %v782_v10, 1 }
 0x169   : > { %v757_v33 = vmax.f32 %v736_v55, %v737_v23  ;;  %v1237_v23 = vld [vmem:[%s1871_s3] ss:$0 sm:$0xff] }
 0x16a   : > { %v784_v26 = vmax.f32 %v782_v10, %v783_v18 }
 0x16b   : > { %v703_v30 = vpop.f32.mrf.mxu3  ;;  %v758_v44 = vrot.slane %v757_v33, 4 }
 0x16c   : > { %v747_v46 = vsel %vm1788_vm0, %v703_v30, -inf  ;;  %v777_v30 = vmax.f32 %v775_v8, %v776_v14 }
 0x16d   : > { %v696_v27 = vpop.f32.mrf.mxu2  ;;  %v792_v41 = vmax.f32 %v746_v43, %v747_v46  ;;  %v759_v39 = vmax.f32 %v757_v33, %v758_v44  ;;  %v812_v43 = vadd.f32 %v1237_v23, %v784_v26 }
 0x16e   : > { %v744_v25 = vsel %vm1794_vm1, %v696_v27, -inf  ;;  %v755_v27 = vrot.slane %v754_v11, 1  ;;  %v811_v50 = vadd.f32 %v1237_v23, %v777_v30 }
 0x16f   : > { %v793_v60 = vrot.slane %v792_v41, 4  ;;  %v760_v62 = vrot.slane %v759_v39, 2  ;;  %v820_v56 = vmax.f32 %v812_v43, 0.0 }
 0x170   : > { %v756_v44 = vmax.f32 %v754_v11, %v755_v27  ;;  %v819_v22 = vmax.f32 %v811_v50, 0.0 }
 0x171   : > { %v794_v1 = vmax.f32 %v792_v41, %v793_v60  ;;  %v761_v4 = vmax.f32 %v759_v39, %v760_v62 }
 0x172   : > { %v808_v41 = vadd.f32 %v1237_v23, %v756_v44  ;;  %v827_v38 = vpack.c.bf16 %v819_v22, %v819_v22 }
 0x173   : > { %v795_v6 = vrot.slane %v794_v1, 2  ;;  %v762_v9 = vrot.slane %v761_v4, 1 }
 0x174   : > { %v816_v60 = vmax.f32 %v808_v41, 0.0 }
 0x175   : > { %v698_v45 = vpop.f32.mrf.mxu2  ;;  %v796_v12 = vmax.f32 %v794_v1, %v795_v6  ;;  %v763_v15 = vmax.f32 %v761_v4, %v762_v9  ;;  %v828_v1 = vpack.c.bf16 %v820_v56, %v820_v56  ;;  %v861_v6 = vunpack.c.l.b16 %v827_v38 }
 0x176   : > { %v745_v35 = vsel %vm1788_vm0, %v698_v45, -inf  ;;  %v824_v3 = vpack.c.bf16 %v816_v60, %v816_v60 }
 0x177   : > { %v785_v47 = vmax.f32 %v744_v25, %v745_v35  ;;  %v797_v55 = vrot.slane %v796_v12, 1  ;;  %v809_v19 = vadd.f32 %v1237_v23, %v763_v15  ;;  %v862_v54 = vunpack.c.l.b16 %v828_v1 }
 0x178   : > { %v858_v10 = vunpack.c.l.b16 %v824_v3  ;;  %v872_v14 = vrot.slane %v861_v6, 5 }
 0x179   : > { %v786_v59 = vrot.slane %v785_v47, 4  ;;  %v798_v20 = vmax.f32 %v796_v12, %v797_v55  ;;  %v817_v53 = vmax.f32 %v809_v19, 0.0 }
 0x17b   : > { %v787_v0 = vmax.f32 %v785_v47, %v786_v59  ;;  %v814_v31 = vadd.f32 %v1237_v23, %v798_v20  ;;  %v825_v48 = vpack.c.bf16 %v817_v53, %v817_v53 }
 0x17d   : > { %v788_v5 = vrot.slane %v787_v0, 2  ;;  %v822_v63 = vmax.f32 %v814_v31, 0.0 }
 0x17f   : > { %v681_v2 = vpop.f32.mrf.mxu0  ;;  %v789_v58 = vmax.f32 %v787_v0, %v788_v5  ;;  %v859_v0 = vunpack.c.l.b16 %v825_v48  ;;  %v830_v5 = vpack.c.bf16 %v822_v63, %v822_v63 }
 0x180   : > { %v738_v16 = vsel %vm1794_vm1, %v681_v2, -inf }
 0x181   : > { %v790_v29 = vrot.slane %v789_v58, 1 }
 0x183   : > { %v706_v7 = vpop.f32.mrf.mxu3  ;;  %v791_v46 = vmax.f32 %v789_v58, %v790_v29 }
 0x184   : > { %v748_v36 = vsel %vm1794_vm1, %v706_v7, -inf  ;;  %v866_v7 = vrot.slane %v859_v0, 7 }
 0x185   : > { %v813_v47 = vadd.f32 %v1237_v23, %v791_v46 }
 0x186   : > { %v868_v15 = vsel %vm867_vm2, %v866_v7, %v858_v10 }
 0x187   : > { %v683_v13 = vpop.f32.mrf.mxu0  ;;  %v821_v61 = vmax.f32 %v813_v47, 0.0 }
 0x188   : > { %v739_v17 = vsel %vm1788_vm0, %v683_v13, -inf  ;;  %v864_v13 = vunpack.c.l.b16 %v830_v5 }
 0x189   : > { %v764_v24 = vmax.f32 %v738_v16, %v739_v17  ;;  %v829_v4 = vpack.c.bf16 %v821_v61, %v821_v61  ;;  %v875_v16 = vrot.slane %v862_v54, 4 }
 0x18a   : > { %v881_v29 = vrot.slane %v864_v13, 2 }
 0x18b   : > { %v765_v33 = vrot.slane %v764_v24, 4  ;;  %v708_v28 = vpop.f32.mrf.mxu3  ;;  %v863_v11 = vunpack.c.l.b16 %v829_v4 }
 0x18c   : > { %v749_v37 = vsel %vm1788_vm0, %v708_v28, -inf }
 0x18d   : > { %v766_v40 = vmax.f32 %v764_v24, %v765_v33  ;;  %v799_v42 = vmax.f32 %v748_v36, %v749_v37  ;;  %v1238_v36 = vld [vmem:[%s1871_s3 + $0x1] ss:$0 sm:$0xff] }
 0x18f   : > { %v767_v49 = vrot.slane %v766_v40, 2  ;;  %v800_v45 = vrot.slane %v799_v42, 4 }
 0x191   : > { %v768_v25 = vmax.f32 %v766_v40, %v767_v49  ;;  %v801_v35 = vmax.f32 %v799_v42, %v800_v45 }
 0x193   : > { %v769_v57 = vrot.slane %v768_v25, 1  ;;  %v802_v39 = vrot.slane %v801_v35, 2 }
 0x195   : > { %v770_v51 = vmax.f32 %v768_v25, %v769_v57  ;;  %v803_v59 = vmax.f32 %v801_v35, %v802_v39 }
 0x197   : > { %v810_v62 = vadd.f32 %v1237_v23, %v770_v51  ;;  %v804_v21 = vrot.slane %v803_v59, 1 }
 0x199   : > { %v818_v2 = vmax.f32 %v810_v62, 0.0  ;;  %v805_v34 = vmax.f32 %v803_v59, %v804_v21 }
 0x19b   : > { %v826_v52 = vpack.c.bf16 %v818_v2, %v818_v2  ;;  %v815_v32 = vadd.f32 %v1237_v23, %v805_v34  ;;  %v878_v23 = vrot.slane %v863_v11, 3 }
 0x19d   : > { %v860_v8 = vunpack.c.l.b16 %v826_v52  ;;  %v823_v9 = vmax.f32 %v815_v32, 0.0 }
 0x19f   : > { %v869_v58 = vrot.slane %v860_v8, 6  ;;  %v831_v12 = vpack.c.bf16 %v823_v9, %v823_v9 }
 0x1a1   : > { %v865_v17 = vunpack.c.l.b16 %v831_v12  ;;  %v871_v18 = vsel %vm870_vm3, %v869_v58, %v868_v15 }
 0x1a2   : > { %v874_v24 = vsel %vm873_vm4, %v872_v14, %v871_v18 }
 0x1a3   : > { %v877_v27 = vsel %vm876_vm5, %v875_v16, %v874_v24  ;;  %v884_v55 = vrot.slane %v865_v17, 1 }
 0x1a4   : > { %v880_v33 = vsel %vm879_vm6, %v878_v23, %v877_v27 }
 0x1a5   : > { %v883_v28 = vsel %vm882_vm7, %v881_v29, %v880_v33 }
 0x1a6   : > { %v886_v30 = vsel %vm885_vm8, %v884_v55, %v883_v28 }
 0x1a7   : > { %v887_v19 = vpack.c.b16 %v886_v30, %v886_v30 }
 0x1a9   : > { %945 = vmatmul.bf16.vlgmr.msra.gmra.mxu1 %v887_v19 }
 0x226   : > { %v946_v37 = vpop.f32.mrf.mxu1 }
 0x227   : > { %v947_v26 = vadd.f32 %v1238_v36, %v946_v37 }
 0x229   : > { %v950_v40 = vmax.f32 %v947_v26, 0.0 }
 0x22b   : > { %951 = vst [vmem:[%s251_s29] sm:$0xff] %v950_v40 }
 0x22c   : > { %1356 = shalt.err (!%p1353_p10)
}
 0x22d   : > { %1170 = dma.vmem_to_hbm [thread:$0]  (%p1504_p3), %s966_s8, 128, %s968_s9, %s953_s21  }
 0x22e   : > { %v948_v42 = vpop.f32.mrf.mxu1 }
 0x22f PF: > { %s979_s28 = sand.u32 1, %s1387_s15   ;;  %p1882_p12 = scmp.ge.s32.totalorder %s1399_s18, 2 }
 0x230   : > { %s980_s12 = scalar_lea.sflag [#allocation4], %s979_s28 }
 0x231   : > { %p1184_p13 = pnand %p1882_p12, %p1473_p6 }
 0x233   : > { %p1185_p0 = pneg %p1184_p13 }
 0x235   : > { %1382 = dma.done.wait (%p1185_p0), %s980_s12, 128  }
 0x236   : > { %1384 = vsyncadd (%p1185_p0), %s980_s12, 4294967168  ;;  %p18_p5 = scmp.ge.s32.totalorder %s1494_s10, 4   ;;  %s1883_s15 = smov %s1391_s16 }
 0x237   : > { %s1884_s16 = smov %s1395_s17  ;;  %s1885_s17 = smov %s1510_s14 }
 0x238   : > { %s1886_s18 = smov %s1494_s10  ;;  %20 = sbr.rel (!%p18_p5) target bundleno = 6 (0x6), region = 89 }
 0x23d   :  { %986 = vsyncpa [#allocation3], 1 }
 0x23e   :  { %988 = vsyncpa [#allocation3 + $0x1], 1 }
 0x23f   :  { %989 = vsyncpa [#allocation6], 1 }
 0x240   :  { %990 = vsyncpa [#allocation4], 1 }
 0x241   :  { %992 = vsyncpa [#allocation4 + $0x1], 1 }

</bundles_post_ra>
